<compile_context>
chip_gen: v5e
topology: v5e:2x2
jax: 0.10.0
libtpu: 0.0.40
codegen_flags: <defaults>
</compile_context>

<pallas_src>
import math

import jax
import jax.numpy as jnp
from jax.experimental import pallas as pl
from jax.experimental.pallas import tpu as pltpu

NOISE_DIM = 10
H1 = 64
H2 = 32
OUT = 1
BN_EPS = 1e-5

PAD_IN = 16            # noise dim zero-padded (in-kernel) to a bf16 sublane tile
W_ROWS = PAD_IN + H1   # 80 rows in the packed bf16 matmul-weight slab
V_ROWS = 8             # rows in the packed f32 vector slab (one f32 sublane tile)


def _generator_kernel(x_ref, w_ref, v_ref, out_ref, xpad_ref):
    B = x_ref.shape[0]

    # ---- In-kernel zero-pad of the noise block: (B,10) -> (B,16) ------------
    xpad_ref[...] = jnp.zeros_like(xpad_ref)
    xpad_ref[:, 0:NOISE_DIM] = x_ref[...]
    x = xpad_ref[...]                                    # (B, 16) f32

    # ---- Parameter slabs: static, tile-aligned slices ------------------------
    w1 = w_ref[0:PAD_IN, :]                              # (16, 64) bf16, rows >=10 zero
    w2 = w_ref[PAD_IN:W_ROWS, :]                         # (64, 64) bf16, cols >=32 zero
    v = v_ref[...]                                       # (8, 64) f32 — single load
    b1, gamma, beta = v[0:1, :], v[1:2, :], v[2:3, :]    # (1, 64) each
    b2, w3_row = v[3:4, :], v[4:5, :]                    # (1, 64), cols >=32 zero
    b3 = v[5:6, 0:1]                                     # (1, 1)

    # ---- Linear(10 -> 64) on the MXU (bf16 operands, f32 acc) + ReLU --------
    h1 = jnp.dot(x.astype(jnp.bfloat16), w1,
                 preferred_element_type=jnp.float32) + b1
    h1 = jnp.maximum(h1, 0.0)                            # (B, 64) f32

    # ---- BatchNorm1d(64), training mode (biased batch stats) ----------------
    # Single fused XLU pass: one (B,128) sublane reduce gives both sums.
    hh = jnp.concatenate([h1, h1 * h1], axis=-1)         # (B, 128)
    s = jnp.sum(hh, axis=0, keepdims=True)               # (1, 128)
    inv_b = 1.0 / B
    mean = s[:, 0:H1] * inv_b
    var = jnp.maximum(s[:, H1:2 * H1] * inv_b - mean * mean, 0.0)
    scale = gamma * jax.lax.rsqrt(var + BN_EPS)          # gamma / sqrt(var + eps)
    shift = beta - mean * scale
    h1n = h1 * scale + shift                             # (B, 64) f32

    # ---- Linear(64 -> 32) (padded to 64 output cols; pad cols stay 0) -------
    h2 = jnp.dot(h1n.astype(jnp.bfloat16), w2,
                 preferred_element_type=jnp.float32) + b2
    h2 = jnp.maximum(h2, 0.0)                            # (B, 64) f32

    # ---- Linear(32 -> 1): VPU multiply + XLU lane reduce, then Sigmoid ------
    logits = jnp.sum(h2 * w3_row, axis=-1, keepdims=True) + b3   # (B, 1)
    out_ref[...] = 1.0 / (1.0 + jnp.exp(-logits))


def _batched_forward(noise3, w_slab, v_slab):
    """noise3: (N, B, NOISE_DIM) f32 -> (N, B, 1) f32. Weights resident across steps."""
    N, B, _ = noise3.shape
    cost = pl.CostEstimate(
        flops=2 * N * B * (NOISE_DIM * H1 + H1 * H2 + H2),
        transcendentals=N * (B + H1),                    # sigmoid per row + rsqrt per feature
        bytes_accessed=(N * B * NOISE_DIM * 4) + (W_ROWS * H1 * 2)
                       + (V_ROWS * H1 * 4) + (N * B * OUT * 4),
    )
    return pl.pallas_call(
        _generator_kernel,
        out_shape=jax.ShapeDtypeStruct((N, B, OUT), jnp.float32),
        grid=(N,),
        in_specs=[
            pl.BlockSpec((None, B, NOISE_DIM), lambda n: (n, 0, 0)),   # streamed
            pl.BlockSpec((W_ROWS, H1), lambda n: (0, 0)),              # resident
            pl.BlockSpec((V_ROWS, H1), lambda n: (0, 0)),              # resident
        ],
        out_specs=pl.BlockSpec((None, B, OUT), lambda n: (n, 0, 0)),
        scratch_shapes=[pltpu.VMEM((B, PAD_IN), jnp.float32)],
        compiler_params=pltpu.CompilerParams(
            dimension_semantics=("parallel",)),          # independent steps; v7x 2-TC sharding
        cost_estimate=cost,
    )(noise3, w_slab, v_slab)


@jax.jit
def standard_generator_forward(noise, w_slab, v_slab):
    """noise: (B, NOISE_DIM) or (N, B, NOISE_DIM). Returns (B, 1) or (N, B, 1)."""
    if noise.ndim == 2:
        return _batched_forward(noise[None], w_slab, v_slab)[0]
    return _batched_forward(noise, w_slab, v_slab)


def init_params(key):
    """PyTorch-default init: Linear U(-1/sqrt(fan_in), 1/sqrt(fan_in));
       BatchNorm gamma=1, beta=0. Biases stored as (1, N)."""
    k1, k2, k3, k4, k5, k6 = jax.random.split(key, 6)

    def linear(kw, kb, fan_in, fan_out):
        bound = 1.0 / math.sqrt(fan_in)
        w = jax.random.uniform(kw, (fan_in, fan_out), jnp.float32, -bound, bound)
        b = jax.random.uniform(kb, (1, fan_out), jnp.float32, -bound, bound)
        return w, b

    w1, b1 = linear(k1, k2, NOISE_DIM, H1)
    w2, b2 = linear(k3, k4, H1, H2)
    w3, b3 = linear(k5, k6, H2, OUT)
    return {
        "w1": w1, "b1": b1,
        "gamma": jnp.ones((1, H1), jnp.float32),
        "beta": jnp.zeros((1, H1), jnp.float32),
        "w2": w2, "b2": b2,
        "w3": w3, "b3": b3,
    }


def pack_params(p):
    """Pack the 8 parameter tensors into 2 pre-padded slabs (done once):
         w_slab (80, 64) bf16 : rows [0:16) = w1 (zero-padded rows),
                                rows [16:80) = w2 (output cols [32:64) zeroed)
         v_slab (8, 64)  f32  : rows b1, gamma, beta, b2(pad), w3^T(pad), b3, 0, 0
    """
    w1_pad = jnp.zeros((PAD_IN, H1), jnp.float32).at[:NOISE_DIM, :].set(p["w1"])
    w2_pad = jnp.zeros((H1, H1), jnp.float32).at[:, :H2].set(p["w2"])
    w_slab = jnp.concatenate([w1_pad, w2_pad], axis=0).astype(jnp.bfloat16)

    b2_pad = jnp.zeros((1, H1), jnp.float32).at[:, :H2].set(p["b2"])
    w3_row = jnp.zeros((1, H1), jnp.float32).at[:, :H2].set(p["w3"].T)
    b3_row = jnp.zeros((1, H1), jnp.float32).at[:, :OUT].set(p["b3"])
    pad = jnp.zeros((V_ROWS - 6, H1), jnp.float32)
    v_slab = jnp.concatenate(
        [p["b1"], p["gamma"], p["beta"], b2_pad, w3_row, b3_row, pad], axis=0)
    return w_slab, v_slab


def _reference_forward(noise, p):
    """Pure-JAX reference (spec math). First two matmul operands are rounded to
       bf16 to mirror the kernel's bf16-MXU / f32-accumulate path."""
    bf = lambda a: a.astype(jnp.bfloat16).astype(jnp.float32)
    h1 = jnp.maximum(bf(noise) @ bf(p["w1"]) + p["b1"], 0.0)
    mean = jnp.mean(h1, axis=0, keepdims=True)
    var = jnp.mean((h1 - mean) ** 2, axis=0, keepdims=True)
    h1n = (h1 - mean) / jnp.sqrt(var + BN_EPS) * p["gamma"] + p["beta"]
    h2 = jnp.maximum(bf(h1n) @ bf(p["w2"]) + p["b2"], 0.0)
    logits = jnp.dot(h2, p["w3"], precision=jax.lax.Precision.HIGHEST) + p["b3"]
    return jax.nn.sigmoid(logits)


if __name__ == "__main__":
    key = jax.random.PRNGKey(0)
    k_params, k_noise, k_noise_b = jax.random.split(key, 3)

    B = 8
    params = init_params(k_params)
    w_slab, v_slab = pack_params(params)

    # Single batch (B, noise_dim) — matches the PyTorch module's forward.
    noise = jax.random.normal(k_noise, (B, NOISE_DIM), dtype=jnp.float32)
    out = jax.block_until_ready(standard_generator_forward(noise, w_slab, v_slab))
    ref = _reference_forward(noise, params)
    assert out.shape == (B, OUT)
    assert jnp.allclose(out, ref, atol=2e-3, rtol=2e-3), (
        f"max abs diff {float(jnp.max(jnp.abs(out - ref)))}")

    # Batched invocation (N, B, noise_dim): launch + weight DMA amortized over a
    # grid; BN stays per-(B=8) block so semantics match per-call PyTorch forwards.
    N = 4
    noise_b = jax.random.normal(k_noise_b, (N, B, NOISE_DIM), dtype=jnp.float32)
    out_b = jax.block_until_ready(standard_generator_forward(noise_b, w_slab, v_slab))
    ref_b = jax.vmap(lambda nb: _reference_forward(nb, params))(noise_b)
    assert out_b.shape == (N, B, OUT)
    assert jnp.allclose(out_b, ref_b, atol=2e-3, rtol=2e-3), (
        f"max abs diff {float(jnp.max(jnp.abs(out_b - ref_b)))}")

    print("KERNEL_OK")
</pallas_src>

<mosaic_0001>
module attributes {stable_mosaic.version = 11 : i64} {
  func.func @_generator_kernel(%arg0: i32, %arg1: memref<1x8x10xf32, #tpu.memory_space<vmem>>, %arg2: memref<80x64xbf16, #tpu.memory_space<vmem>>, %arg3: memref<8x64xf32, #tpu.memory_space<vmem>>, %arg4: memref<1x8x1xf32, #tpu.memory_space<vmem>>, %arg5: memref<8x16xf32, #tpu.memory_space<vmem>>) attributes {dimension_semantics = [#tpu.dimension_semantics<parallel>], iteration_bounds = array<i64: 1>, scalar_prefetch = 0 : i64, scratch_operands = 1 : i64, tpu.core_type = #tpu.core_type<tc>, window_params = [{transform_indices = @transform_0, window_bounds = array<i64: 1, 8, 10>}, {pipeline_mode = #tpu.pipeline_mode<synchronous>, transform_indices = @transform_1, window_bounds = array<i64: 80, 64>}, {pipeline_mode = #tpu.pipeline_mode<synchronous>, transform_indices = @transform_2, window_bounds = array<i64: 8, 64>}, {transform_indices = @transform_3, window_bounds = array<i64: 1, 8, 1>}]} {
    %cst = arith.constant 0.000000e+00 : f32
    %0 = vector.broadcast %cst : f32 to vector<8x16xf32>
    %c0 = arith.constant 0 : index
    %c0_0 = arith.constant 0 : index
    %1 = vector.load %arg5[%c0, %c0_0] : memref<8x16xf32, #tpu.memory_space<vmem>>, vector<8x16xf32>
    tpu.vector_store %arg5[%c0, %c0_0], %0 {strides = array<i32>} : memref<8x16xf32, #tpu.memory_space<vmem>>, vector<8x16xf32>,
    %c0_1 = arith.constant 0 : index
    %c0_2 = arith.constant 0 : index
    %c0_3 = arith.constant 0 : index
    %2 = vector.load %arg1[%c0_1, %c0_2, %c0_3] : memref<1x8x10xf32, #tpu.memory_space<vmem>>, vector<1x8x10xf32>
    %3 = vector.shape_cast %2 : vector<1x8x10xf32> to vector<8x10xf32>
    %c0_4 = arith.constant 0 : index
    %c0_5 = arith.constant 0 : index
    %4 = vector.load %arg5[%c0_4, %c0_5] : memref<8x16xf32, #tpu.memory_space<vmem>>, vector<8x10xf32>
    tpu.vector_store %arg5[%c0_4, %c0_5], %3 {strides = array<i32>} : memref<8x16xf32, #tpu.memory_space<vmem>>, vector<8x10xf32>,
    %c0_6 = arith.constant 0 : index
    %c0_7 = arith.constant 0 : index
    %5 = vector.load %arg5[%c0_6, %c0_7] : memref<8x16xf32, #tpu.memory_space<vmem>>, vector<8x16xf32>
    %c0_8 = arith.constant 0 : index
    %c0_9 = arith.constant 0 : index
    %6 = vector.load %arg2[%c0_8, %c0_9] : memref<80x64xbf16, #tpu.memory_space<vmem>>, vector<16x64xbf16>
    %c16 = arith.constant 16 : index
    %c0_10 = arith.constant 0 : index
    %7 = vector.load %arg2[%c16, %c0_10] : memref<80x64xbf16, #tpu.memory_space<vmem>>, vector<64x64xbf16>
    %c0_11 = arith.constant 0 : index
    %c0_12 = arith.constant 0 : index
    %8 = vector.load %arg3[%c0_11, %c0_12] : memref<8x64xf32, #tpu.memory_space<vmem>>, vector<8x64xf32>
    %9 = vector.extract_strided_slice %8 {offsets = [0, 0], sizes = [1, 64], strides = [1, 1]} : vector<8x64xf32> to vector<1x64xf32>
    %10 = vector.extract_strided_slice %8 {offsets = [1, 0], sizes = [1, 64], strides = [1, 1]} : vector<8x64xf32> to vector<1x64xf32>
    %11 = vector.extract_strided_slice %8 {offsets = [2, 0], sizes = [1, 64], strides = [1, 1]} : vector<8x64xf32> to vector<1x64xf32>
    %12 = vector.extract_strided_slice %8 {offsets = [3, 0], sizes = [1, 64], strides = [1, 1]} : vector<8x64xf32> to vector<1x64xf32>
    %13 = vector.extract_strided_slice %8 {offsets = [4, 0], sizes = [1, 64], strides = [1, 1]} : vector<8x64xf32> to vector<1x64xf32>
    %14 = vector.extract_strided_slice %8 {offsets = [5, 0], sizes = [1, 1], strides = [1, 1]} : vector<8x64xf32> to vector<1x1xf32>
    %15 = arith.truncf %5 : vector<8x16xf32> to vector<8x16xbf16>
    %cst_13 = arith.constant dense<0.000000e+00> : vector<8x64xf32>
    %16 = tpu.matmul %15, %6, %cst_13 {dimension_numbers = #tpu.dot_dimension_numbers<[1], [0], [0], [1], [0, 0, 1, 1], [], []>} : vector<8x16xbf16>, vector<16x64xbf16>, vector<8x64xf32> -> vector<8x64xf32>
    %17 = vector.broadcast %9 : vector<1x64xf32> to vector<8x64xf32>
    %18 = arith.addf %16, %17 : vector<8x64xf32>
    %cst_14 = arith.constant 0.000000e+00 : f32
    %19 = vector.broadcast %cst_14 : f32 to vector<8x64xf32>
    %20 = arith.maximumf %18, %19 : vector<8x64xf32>
    %21 = arith.mulf %20, %20 : vector<8x64xf32>
    %22 = tpu.concatenate %20, %21 in 1 : vector<8x64xf32>, vector<8x64xf32> -> vector<8x128xf32>
    %cst_15 = arith.constant dense<0.000000e+00> : vector<128xf32>
    %23 = vector.multi_reduction <add>, %22, %cst_15 [0] : vector<8x128xf32> to vector<128xf32>
    %24 = vector.shape_cast %23 : vector<128xf32> to vector<1x128xf32>
    %25 = vector.extract_strided_slice %24 {offsets = [0, 0], sizes = [1, 64], strides = [1, 1]} : vector<1x128xf32> to vector<1x64xf32>
    %cst_16 = arith.constant 1.250000e-01 : f32
    %26 = vector.broadcast %cst_16 : f32 to vector<1x64xf32>
    %27 = arith.mulf %25, %26 : vector<1x64xf32>
    %28 = vector.extract_strided_slice %24 {offsets = [0, 64], sizes = [1, 64], strides = [1, 1]} : vector<1x128xf32> to vector<1x64xf32>
    %cst_17 = arith.constant 1.250000e-01 : f32
    %29 = vector.broadcast %cst_17 : f32 to vector<1x64xf32>
    %30 = arith.mulf %28, %29 : vector<1x64xf32>
    %31 = arith.mulf %27, %27 : vector<1x64xf32>
    %32 = arith.subf %30, %31 : vector<1x64xf32>
    %cst_18 = arith.constant 0.000000e+00 : f32
    %33 = vector.broadcast %cst_18 : f32 to vector<1x64xf32>
    %34 = arith.maximumf %32, %33 : vector<1x64xf32>
    %cst_19 = arith.constant 9.99999974E-6 : f32
    %35 = vector.broadcast %cst_19 : f32 to vector<1x64xf32>
    %36 = arith.addf %34, %35 : vector<1x64xf32>
    %37 = math.rsqrt %36 : vector<1x64xf32>
    %38 = arith.mulf %10, %37 : vector<1x64xf32>
    %39 = arith.mulf %27, %38 : vector<1x64xf32>
    %40 = arith.subf %11, %39 : vector<1x64xf32>
    %41 = vector.broadcast %38 : vector<1x64xf32> to vector<8x64xf32>
    %42 = arith.mulf %20, %41 : vector<8x64xf32>
    %43 = vector.broadcast %40 : vector<1x64xf32> to vector<8x64xf32>
    %44 = arith.addf %42, %43 : vector<8x64xf32>
    %45 = arith.truncf %44 : vector<8x64xf32> to vector<8x64xbf16>
    %cst_20 = arith.constant dense<0.000000e+00> : vector<8x64xf32>
    %46 = tpu.matmul %45, %7, %cst_20 {dimension_numbers = #tpu.dot_dimension_numbers<[1], [0], [0], [1], [0, 0, 1, 1], [], []>} : vector<8x64xbf16>, vector<64x64xbf16>, vector<8x64xf32> -> vector<8x64xf32>
    %47 = vector.broadcast %12 : vector<1x64xf32> to vector<8x64xf32>
    %48 = arith.addf %46, %47 : vector<8x64xf32>
    %cst_21 = arith.constant 0.000000e+00 : f32
    %49 = vector.broadcast %cst_21 : f32 to vector<8x64xf32>
    %50 = arith.maximumf %48, %49 : vector<8x64xf32>
    %51 = vector.broadcast %13 : vector<1x64xf32> to vector<8x64xf32>
    %52 = arith.mulf %50, %51 : vector<8x64xf32>
    %cst_22 = arith.constant dense<0.000000e+00> : vector<8xf32>
    %53 = vector.multi_reduction <add>, %52, %cst_22 [1] : vector<8x64xf32> to vector<8xf32>
    %54 = vector.shape_cast %53 : vector<8xf32> to vector<8x1xf32>
    %55 = vector.broadcast %14 : vector<1x1xf32> to vector<8x1xf32>
    %56 = arith.addf %54, %55 : vector<8x1xf32>
    %cst_23 = arith.constant 0.000000e+00 : f32
    %57 = vector.broadcast %cst_23 : f32 to vector<8x1xf32>
    %58 = arith.subf %57, %56 : vector<8x1xf32>
    %59 = math.exp %58 : vector<8x1xf32>
    %cst_24 = arith.constant 1.000000e+00 : f32
    %60 = vector.broadcast %cst_24 : f32 to vector<8x1xf32>
    %61 = arith.addf %60, %59 : vector<8x1xf32>
    %cst_25 = arith.constant 1.000000e+00 : f32
    %62 = vector.broadcast %cst_25 : f32 to vector<8x1xf32>
    %63 = arith.divf %62, %61 : vector<8x1xf32>
    %c0_26 = arith.constant 0 : index
    %c0_27 = arith.constant 0 : index
    %c0_28 = arith.constant 0 : index
    %64 = vector.load %arg4[%c0_26, %c0_27, %c0_28] : memref<1x8x1xf32, #tpu.memory_space<vmem>>, vector<1x8x1xf32>
    %65 = vector.shape_cast %64 : vector<1x8x1xf32> to vector<8x1xf32>
    %66 = vector.shape_cast %63 : vector<8x1xf32> to vector<1x8x1xf32>
    tpu.vector_store %arg4[%c0_26, %c0_27, %c0_28], %66 {strides = array<i32>} : memref<1x8x1xf32, #tpu.memory_space<vmem>>, vector<1x8x1xf32>,
    return
  }
  func.func @transform_0(%arg0: i32) -> (i32, i32, i32) {
    %c0_i32 = arith.constant 0 : i32
    %c0_i32_0 = arith.constant 0 : i32
    %c0_i32_1 = arith.constant 0 : i32
    return %arg0, %c0_i32, %c0_i32_0 : i32, i32, i32
  }
  func.func @transform_1(%arg0: i32) -> (i32, i32) {
    %c0_i32 = arith.constant 0 : i32
    %c0_i32_0 = arith.constant 0 : i32
    %c0_i32_1 = arith.constant 0 : i32
    return %c0_i32, %c0_i32_0 : i32, i32
  }
  func.func @transform_2(%arg0: i32) -> (i32, i32) {
    %c0_i32 = arith.constant 0 : i32
    %c0_i32_0 = arith.constant 0 : i32
    %c0_i32_1 = arith.constant 0 : i32
    return %c0_i32, %c0_i32_0 : i32, i32
  }
  func.func @transform_3(%arg0: i32) -> (i32, i32, i32) {
    %c0_i32 = arith.constant 0 : i32
    %c0_i32_0 = arith.constant 0 : i32
    %c0_i32_1 = arith.constant 0 : i32
    return %arg0, %c0_i32, %c0_i32_0 : i32, i32, i32
  }
}

</mosaic_0001>

<bundles_post_ra>
// kernel: standard_generator_forward.1
= control target key start
LH: loop header
LB: loop body
LE: loop exit
PB: predicated region body
PF: predicated region fallthrough
CT: control target
= control target key end

     0   :  { %vm15_vm0 = vcmask 130048   ;;  %vm18_vm1 = vcmask 80896   ;;  %v214_v1 = vmov 0.0   ;;  %s215_s18 = smov 64   ;;  %vm62_vm2 = vcmask 523264   ;;  %s274_s1 = inlined_call_operand.vmem [shape: bf16[80,64], index: 1, kind: input, shape index: {}]   ;;  %s275_s0 = inlined_call_operand.vmem [shape: f32[1,8,10], index: 0, kind: input, shape index: {}]   ;;  %s276_s2 = inlined_call_operand.vmem [shape: f32[8,64], index: 2, kind: input, shape index: {}]   ;;  %s277_s3 = inlined_call_operand.vmem [shape: f32[1,8,1], index: 3, kind: output, shape index: {}]  }
   0x1   :  { %v201_v0 = vld [vmem:[%s274_s1] sm:$0xff]  ;;  %16 = vst.msk [vmem:[#allocation2] sm:$0xff] %vm15_vm0, %v214_v1  ;;  %v204_v35 = vld [vmem:[%s274_s1 + $0x18] sm:$0xff]  ;;  %v203_v36 = vld [vmem:[%s274_s1 + $0x10] sm:$0xff]  ;;  %vm173_vm8 = vcmask 7168  }
   0x2   :  { %v17_v2 = vld [vmem:[%s275_s0] sm:$0xff]  ;;  %50 = vmatpush.bf16.msra.mxu0 %v201_v0  ;;  %v202_v37 = vld [vmem:[%s274_s1 + $0x8] sm:$0xff] }
   0x3   :  { %19 = vst.msk [vmem:[#allocation2] sm:$0xff] %vm18_vm1, %v17_v2  ;;  %v245_v5 = vld [vmem:[%s276_s2] sm:$0xff] }
   0x4   :  { %v33_v6 = vperm.slane %v245_v5, 0  ;;  %v205_v22 = vld [vmem:[%s274_s1 + $0x20] sm:$0xff]  ;;  %v105_v48 = vperm.slane %v245_v5, 3  ;;  %v147_v51 = vperm.slane %v245_v5, 4  ;;  %v152_v56 = vperm.slane %v245_v5, 5 }
   0x5   :  { %137 = vmatpush.bf16.msra.mxu1 %v205_v22 }
   0x9   :  { %138 = vmatpush.bf16.msra.mxu1 %v204_v35 }
   0xa   :  { %v20_v3 = vld [vmem:[#allocation2] sm:$0xff] }
   0xb   :  { %v32_v4 = vpack.c.bf16 %v20_v3, %v20_v3 }
   0xd   :  { %183 = vmatmul.msk.bf16.vlgmr.msra.gmra.mxu0 %vm15_vm0, %v32_v4  ;;  %139 = vmatpush.bf16.msra.mxu1 %v203_v36 }
  0x11   :  { %140 = vmatpush.bf16.msra.mxu1 %v202_v37 }
  0x8a   :  { %v52_v7 = vpop.f32.mrf.mxu0 }
  0x8b   :  { %v53_v8 = vadd.f32 %v52_v7, %v33_v6 }
  0x8d   :  { %v56_v9 = vmax.f32 %v53_v8, 0.0 }
  0x8f   :  { %v57_v10 = vmul.f32 %v56_v9, %v56_v9 }
  0x91   :  { %59 = vrot.lane.b32.xlu0 %v57_v10, %s215_s18 }
  0x92   :  { %v54_v11 = vpop.f32.mrf.mxu0 }
 0x103   :  { %v60_v12 = vpop.permute.xlu0 %59 }
 0x104   :  { %v63_v13 = vsel %vm62_vm2, %v56_v9, %v60_v12 }
 0x105   :  { %v64_v14 = vrot.slane %v63_v13, 4 }
 0x107   :  { %v65_v15 = vadd.f32 %v64_v14, %v63_v13 }
 0x109   :  { %v66_v16 = vrot.slane %v65_v15, 2 }
 0x10b   :  { %v67_v17 = vadd.f32 %v66_v16, %v65_v15 }
 0x10d   :  { %v68_v18 = vrot.slane %v67_v17, 1 }
 0x10f   :  { %v69_v19 = vadd.f32 %v68_v18, %v67_v17 }
 0x111   :  { %v70_v20 = vmul.f32 0.125, %v69_v19 }
 0x113   :  { %v71_v21 = vmul.f32 %v70_v20, %v70_v20 }
 0x115   :  { %73 = vrot.lane.b32.xlu0 %v71_v21, %s215_s18 }
 0x187   :  { %v74_v23 = vpop.permute.xlu0 %73 }
 0x188   :  { %v76_v24 = vsub.f32 %v70_v20, %v74_v23 }
 0x18a   :  { %v77_v25 = vmax.f32 %v76_v24, 0.0 }
 0x18c   :  { %v78_v26 = vadd.f32 1e-05, %v77_v25 }
 0x18e   :  { %208 = vrsqrt.f32 %v78_v26  ;;  %vm85_vm4 = vweird.f32 %v78_v26 }
 0x194   :  { %v209_v27 = vpop.eup %208 }
 0x195   :  { %v80_v28 = vmul.f32 %v209_v27, %v78_v26  ;;  %vm86_vm3 = vweird.f32 %v209_v27 }
 0x196   :  { %vm87_vm5 = vmor %vm85_vm4, %vm86_vm3 }
 0x197   :  { %v81_v29 = vmul.f32 %v209_v27, %v80_v28 }
 0x199   :  { %v82_v30 = vmul.f32 0.5, %v81_v29 }
 0x19b   :  { %v83_v31 = vsub.f32 1.5, %v82_v30 }
 0x19d   :  { %v84_v32 = vmul.f32 %v209_v27, %v83_v31 }
 0x19f   :  { %v88_v33 = vsel %vm87_vm5, %v209_v27, %v84_v32 }
 0x1a0   :  { %v90_v34 = vrot.slane %v88_v33, 7 }
 0x1a2   :  { %91 = vrot.lane.b32.xlu1 %v90_v34, %s215_s18 }
 0x214   :  { %v92_v38 = vpop.permute.xlu1 %91 }
 0x215   :  { %v94_v39 = vmul.f32 %v92_v38, %v245_v5 }
 0x217   :  { %v95_v40 = vmul.f32 %v94_v39, %v70_v20  ;;  %v100_v42 = vperm.slane %v94_v39, 1 }
 0x219   :  { %v97_v41 = vrot.slane %v95_v40, 7  ;;  %v101_v44 = vmul.f32 %v100_v42, %v56_v9 }
 0x21b   :  { %v99_v43 = vsub.f32 %v245_v5, %v97_v41 }
 0x21d   :  { %v102_v45 = vperm.slane %v99_v43, 2 }
 0x21f   :  { %v103_v46 = vadd.f32 %v102_v45, %v101_v44 }
 0x221   :  { %v104_v47 = vpack.c.bf16 %v103_v46, %v103_v46 }
 0x223   :  { %200 = vmatmul.msk.bf16.vlgmr.msra.gmra.mxu1 %vm62_vm2, %v104_v47 }
 0x2a0   :  { %v142_v49 = vpop.f32.mrf.mxu1 }
 0x2a1   :  { %v143_v50 = vadd.f32 %v142_v49, %v105_v48 }
 0x2a3   :  { %v146_v52 = vmax.f32 %v143_v50, 0.0 }
 0x2a5   :  { %v148_v53 = vmul.f32 %v147_v51, %v146_v52 }
 0x2a7   :  { %v149_v54 = vsel %vm62_vm2, %v148_v53, 0.0 }
 0x2a8   :  { %v144_v55 = vpop.f32.mrf.mxu1  ;;  %150 = vadd.xlane.f32.xlu1 %v149_v54 }
 0x31b   :  { %v151_v57 = vpop.xlane.xlu1 %150 }
 0x31c   :  { %v153_v58 = vadd.f32 %v152_v56, %v151_v57 }
 0x31e   :  { %v154_v59 = vsub.f32 0.0, %v153_v58 }
 0x320   :  { %v155_v60 = vmul.f32 1.442695, %v154_v59 }
 0x322   :  { %210 = vpow2.f32 %v155_v60 }
 0x328   :  { %v211_v61 = vpop.eup %210 }
 0x329   :  { %v157_v62 = vadd.f32 1.0, %v211_v61 }
 0x32b   :  { %212 = vrcp.f32 %v157_v62  ;;  %v169_v2 = vand.u32 2147483648, %v157_v62  ;;  %v167_v4 = vand.u32 2147483647, %v157_v62  ;;  %vm163_vm7 = vweird.f32 %v157_v62 }
 0x32d   :  { %v170_v5 = vor.u32 1.1754944e-38, %v169_v2  ;;  %vm168_vm10 = vcmp.eq.f32.partialorder %v167_v4, 8.507059e+37 }
 0x331   :  { %v213_v63 = vpop.eup %212 }
 0x332   :  { %v159_v0 = vmul.f32 %v213_v63, %v157_v62  ;;  %vm164_vm6 = vweird.f32 %v213_v63 }
 0x333   :  { %vm165_vm9 = vmor %vm163_vm7, %vm164_vm6 }
 0x334   :  { %v160_v1 = vsub.f32 1.0, %v159_v0 }
 0x336   :  { %v161_v3 = vmul.f32 %v213_v63, %v160_v1 }
 0x338   :  { %v162_v6 = vadd.f32 %v213_v63, %v161_v3 }
 0x33a   :  { %v166_v7 = vsel %vm165_vm9, %v213_v63, %v162_v6 }
 0x33b   :  { %v171_v8 = vsel %vm168_vm10, %v170_v5, %v166_v7 }
 0x33c   :  { %174 = vst.msk [vmem:[%s277_s3] sm:$0xff] %vm173_vm8, %v171_v8 }

</bundles_post_ra>
